<compile_context>
chip_gen: v7x
topology: tpu7x:2x2x1
jax: 0.10.0
libtpu: 0.0.40
codegen_flags: <defaults>
</compile_context>

<pallas_src>
import functools

import jax
import jax.numpy as jnp
from jax.experimental import pallas as pl
from jax.experimental.pallas import tpu as pltpu


def _double_conv_kernel(x_ref, w1_ref, t1_ref, w2_ref, t2_ref, o_ref,
                        *, H, W, C_mid_pad):
    P = H * W
    x = x_ref[0]                                               # (C_in, P), lane-dense

    # ---- conv1 (1x1): one MXU matmul, f32 accumulation ----
    h32 = jnp.dot(w1_ref[...], x, preferred_element_type=jnp.float32)   # (C_mid_pad, P)
    h32 = jnp.maximum(h32 + t1_ref[...], 0.0)                  # folded bias+BN shift, ReLU (f32)
    h = h32.astype(x.dtype)                                    # taps built in compute dtype

    # ---- hoisted column-boundary pre-masks (2 selects total; row masks are redundant) ----
    col = jax.lax.broadcasted_iota(jnp.int32, (1, P), 1) % W   # (1, P), broadcast in where
    zero = jnp.zeros_like(h)
    h_zl = jnp.where(col != 0, h, zero)                        # source col 0 zeroed   -> dx=+1
    h_zr = jnp.where(col != W - 1, h, zero)                    # source col W-1 zeroed -> dx=-1
    srcs = {-1: h_zr, 0: h, 1: h_zl}

    # ---- conv2 (3x3, pad=1): 9 pure lane shifts -> one fused im2col matmul ----
    taps = []
    for dy in (-1, 0, 1):
        for dx in (-1, 0, 1):
            src = srcs[dx]
            s = dy * W + dx                                    # flat-pixel source offset
            if s == 0:
                shifted = src
            elif s > 0:
                shifted = jnp.concatenate(
                    [src[:, s:], jnp.zeros((C_mid_pad, s), src.dtype)], axis=1)
            else:
                shifted = jnp.concatenate(
                    [jnp.zeros((C_mid_pad, -s), src.dtype), src[:, :P + s]], axis=1)
            taps.append(shifted)

    im2col = jnp.concatenate(taps, axis=0)                     # (9*C_mid_pad, P)

    y = jnp.dot(w2_ref[...], im2col, preferred_element_type=jnp.float32)  # (C_out_pad, P) f32
    y = jnp.maximum(y + t2_ref[...], 0.0)                      # folded bias+BN shift, ReLU (f32)
    o_ref[0] = y.astype(o_ref.dtype)                           # lane-dense store


def _pad_to(a, n, axis):
    pad = n - a.shape[axis]
    if pad == 0:
        return a
    widths = [(0, 0)] * a.ndim
    widths[axis] = (0, pad)
    return jnp.pad(a, widths)


def double_conv_pallas(x_nchw, params, *,
                       compute_dtype=jnp.bfloat16, out_dtype=jnp.float32):
    """x_nchw: (N, in_ch+mid_ch, H, W) float32. Returns (N, out_ch, H, W) out_dtype.

    compute_dtype: MXU operand dtype (bf16 default; f32 accumulation + f32 epilogues always).
    """
    (w1, b1, g1, be1, m1, v1, w2, b2, g2, be2, m2, v2) = params
    eps = 1e-5

    N, C_in, H, W = x_nchw.shape
    C_mid = w1.shape[1]
    C_out = w2.shape[3]
    P = H * W

    # Sublane-aligned channel padding (16 for bf16 operands, 8 for f32).
    sub_c = 16 if compute_dtype == jnp.bfloat16 else 8
    sub_o = 16 if out_dtype == jnp.bfloat16 else 8
    C_mid_pad = ((C_mid + sub_c - 1) // sub_c) * sub_c
    C_out_pad = ((C_out + sub_o - 1) // sub_o) * sub_o

    # Fold BN (inference) + conv bias: scale goes INTO the weights (f32), shift stays.
    scale1 = g1 / jnp.sqrt(v1 + eps)
    shift1 = be1 + scale1 * (b1 - m1)
    scale2 = g2 / jnp.sqrt(v2 + eps)
    shift2 = be2 + scale2 * (b2 - m2)

    # conv1 weights: (C_in, C_mid) -> scaled (C_mid, C_in), padded to C_mid_pad rows.
    w1_s = (scale1[:, None] * jnp.transpose(w1, (1, 0)))                  # f32 fold
    w1_s = _pad_to(w1_s, C_mid_pad, 0).astype(compute_dtype)
    t1 = _pad_to(shift1, C_mid_pad, 0).reshape(C_mid_pad, 1)              # f32

    # conv2 weights: HWIO (3,3,C_mid,C_out) -> scaled, C_mid padded, flattened to
    # (C_out_pad, 9*C_mid_pad) with tap order (ky, kx, c) matching the in-kernel build.
    w2_s = w2 * scale2[None, None, None, :]                               # f32 fold
    w2_s = _pad_to(w2_s, C_mid_pad, 2)
    w2_s = jnp.transpose(w2_s, (3, 0, 1, 2)).reshape(C_out, 9 * C_mid_pad)
    w2_s = _pad_to(w2_s, C_out_pad, 0).astype(compute_dtype)
    t2 = _pad_to(shift2, C_out_pad, 0).reshape(C_out_pad, 1)              # f32

    # NCHW -> (N, C, H*W): free contiguous reshape; cast once (halves x DMA for bf16).
    x_flat = x_nchw.reshape(N, C_in, P).astype(compute_dtype)

    kernel = functools.partial(_double_conv_kernel, H=H, W=W, C_mid_pad=C_mid_pad)
    full = lambda shape: pl.BlockSpec(shape, lambda n: (0,) * len(shape))

    out_flat = pl.pallas_call(
        kernel,
        out_shape=jax.ShapeDtypeStruct((N, C_out_pad, P), out_dtype),
        grid_spec=pltpu.PrefetchScalarGridSpec(
            num_scalar_prefetch=0,
            grid=(N,),
            in_specs=[
                pl.BlockSpec((1, C_in, P), lambda n: (n, 0, 0)),   # x (lane-dense)
                full((C_mid_pad, C_in)),                           # scale-folded w1
                full((C_mid_pad, 1)),                              # shift1 (f32)
                full((C_out_pad, 9 * C_mid_pad)),                  # scale-folded, flattened w2
                full((C_out_pad, 1)),                              # shift2 (f32)
            ],
            out_specs=pl.BlockSpec((1, C_out_pad, P), lambda n: (n, 0, 0)),
        ),
        compiler_params=pltpu.CompilerParams(
            dimension_semantics=("parallel",),
            vmem_limit_bytes=64 * 1024 * 1024),
    )(x_flat, w1_s, t1, w2_s, t2)

    # Drop padded output channels; (N, C_out, H*W) -> (N, C_out, H, W) is a free reshape.
    return out_flat[:, :C_out, :].reshape(N, C_out, H, W)


def double_conv_ref(x_nchw, params):
    """Pure-JAX reference (inference-mode BN), for correctness check."""
    (w1, b1, g1, be1, m1, v1, w2, b2, g2, be2, m2, v2) = params
    eps = 1e-5
    x = jnp.transpose(x_nchw, (0, 2, 3, 1))                   # NHWC

    h = jnp.einsum("nhwc,cm->nhwm", x, w1) + b1               # 1x1 conv
    h = (h - m1) / jnp.sqrt(v1 + eps) * g1 + be1
    h = jnp.maximum(h, 0.0)

    y = jax.lax.conv_general_dilated(                         # 3x3 conv, pad=1 (HWIO)
        h, w2, window_strides=(1, 1), padding="SAME",
        dimension_numbers=("NHWC", "HWIO", "NHWC")) + b2
    y = (y - m2) / jnp.sqrt(v2 + eps) * g2 + be2
    y = jnp.maximum(y, 0.0)
    return jnp.transpose(y, (0, 3, 1, 2))


def init_params(key, in_ch, mid_ch, out_ch):
    c_total = in_ch + mid_ch
    ks = jax.random.split(key, 8)
    w1 = jax.random.normal(ks[0], (c_total, mid_ch), jnp.float32) * 0.1
    b1 = jax.random.normal(ks[1], (mid_ch,), jnp.float32) * 0.05
    g1 = 1.0 + 0.1 * jax.random.normal(ks[2], (mid_ch,), jnp.float32)
    be1 = 0.05 * jax.random.normal(ks[3], (mid_ch,), jnp.float32)
    m1 = 0.02 * jax.random.normal(ks[4], (mid_ch,), jnp.float32)
    v1 = 1.0 + 0.1 * jax.nn.softplus(jax.random.normal(ks[5], (mid_ch,), jnp.float32))
    w2 = jax.random.normal(ks[6], (3, 3, mid_ch, out_ch), jnp.float32) * 0.1
    b2 = jax.random.normal(ks[7], (out_ch,), jnp.float32) * 0.05
    g2 = jnp.linspace(0.9, 1.1, out_ch).astype(jnp.float32)
    be2 = jnp.linspace(-0.05, 0.05, out_ch).astype(jnp.float32)
    m2 = jnp.zeros((out_ch,), jnp.float32)
    v2 = jnp.ones((out_ch,), jnp.float32)
    return (w1, b1, g1, be1, m1, v1, w2, b2, g2, be2, m2, v2)


if __name__ == "__main__":
    key = jax.random.PRNGKey(0)
    in_ch, mid_ch, out_ch = 4, 4, 8
    N, H, W = 2, 16, 16

    kx, kp = jax.random.split(key)
    x = jax.random.normal(kx, (N, in_ch + mid_ch, H, W), jnp.float32)
    params = init_params(kp, in_ch, mid_ch, out_ch)

    ref = jax.block_until_ready(double_conv_ref(x, params))

    # Default path: bf16 MXU operands, f32 accumulation/epilogues.
    out_bf16 = jax.block_until_ready(double_conv_pallas(x, params))
    assert out_bf16.shape == (N, out_ch, H, W), out_bf16.shape
    assert jnp.allclose(out_bf16, ref, atol=5e-2, rtol=5e-2), \
        float(jnp.max(jnp.abs(out_bf16 - ref)))

    # f32 MXU path: exact semantics, tight tolerance.
    out_f32 = jax.block_until_ready(
        double_conv_pallas(x, params, compute_dtype=jnp.float32))
    assert out_f32.shape == (N, out_ch, H, W), out_f32.shape
    assert jnp.allclose(out_f32, ref, atol=1e-4, rtol=1e-4), \
        float(jnp.max(jnp.abs(out_f32 - ref)))

    print("KERNEL_OK")
</pallas_src>

<mosaic_0001>
module attributes {stable_mosaic.version = 11 : i64} {
  func.func @_double_conv_kernel(%arg0: i32, %arg1: memref<1x8x256xbf16, #tpu.memory_space<vmem>>, %arg2: memref<16x8xbf16, #tpu.memory_space<vmem>>, %arg3: memref<16x1xf32, #tpu.memory_space<vmem>>, %arg4: memref<8x144xbf16, #tpu.memory_space<vmem>>, %arg5: memref<8x1xf32, #tpu.memory_space<vmem>>, %arg6: memref<1x8x256xf32, #tpu.memory_space<vmem>>) attributes {dimension_semantics = [#tpu.dimension_semantics<parallel>], iteration_bounds = array<i64: 2>, scalar_prefetch = 0 : i64, scratch_operands = 0 : i64, tpu.core_type = #tpu.core_type<tc>, window_params = [{transform_indices = @transform_0, window_bounds = array<i64: 1, 8, 256>}, {pipeline_mode = #tpu.pipeline_mode<synchronous>, transform_indices = @transform_1, window_bounds = array<i64: 16, 8>}, {pipeline_mode = #tpu.pipeline_mode<synchronous>, transform_indices = @transform_2, window_bounds = array<i64: 16, 1>}, {pipeline_mode = #tpu.pipeline_mode<synchronous>, transform_indices = @transform_3, window_bounds = array<i64: 8, 144>}, {pipeline_mode = #tpu.pipeline_mode<synchronous>, transform_indices = @transform_4, window_bounds = array<i64: 8, 1>}, {transform_indices = @transform_5, window_bounds = array<i64: 1, 8, 256>}]} {
    %c0 = arith.constant 0 : index
    %c0_0 = arith.constant 0 : index
    %c0_1 = arith.constant 0 : index
    %0 = vector.load %arg1[%c0, %c0_0, %c0_1] : memref<1x8x256xbf16, #tpu.memory_space<vmem>>, vector<1x8x256xbf16>
    %1 = vector.shape_cast %0 : vector<1x8x256xbf16> to vector<8x256xbf16>
    %c0_2 = arith.constant 0 : index
    %c0_3 = arith.constant 0 : index
    %2 = vector.load %arg2[%c0_2, %c0_3] : memref<16x8xbf16, #tpu.memory_space<vmem>>, vector<16x8xbf16>
    %cst = arith.constant dense<0.000000e+00> : vector<16x256xf32>
    %3 = tpu.matmul %2, %1, %cst {dimension_numbers = #tpu.dot_dimension_numbers<[1], [0], [0], [1], [0, 0, 1, 1], [], []>} : vector<16x8xbf16>, vector<8x256xbf16>, vector<16x256xf32> -> vector<16x256xf32>
    %c0_4 = arith.constant 0 : index
    %c0_5 = arith.constant 0 : index
    %4 = vector.load %arg3[%c0_4, %c0_5] : memref<16x1xf32, #tpu.memory_space<vmem>>, vector<16x1xf32>
    %5 = vector.broadcast %4 : vector<16x1xf32> to vector<16x256xf32>
    %6 = arith.addf %3, %5 : vector<16x256xf32>
    %cst_6 = arith.constant 0.000000e+00 : f32
    %7 = vector.broadcast %cst_6 : f32 to vector<16x256xf32>
    %8 = arith.maximumf %6, %7 : vector<16x256xf32>
    %9 = arith.truncf %8 : vector<16x256xf32> to vector<16x256xbf16>
    %10 = tpu.iota {dimensions = array<i32: 1>} : vector<1x256xi32>
    %c16_i32 = arith.constant 16 : i32
    %c0_i32 = arith.constant 0 : i32
    %11 = arith.cmpi eq, %c16_i32, %c0_i32 : i32
    %c1_i32 = arith.constant 1 : i32
    %12 = arith.select %11, %c1_i32, %c16_i32 : i32
    %13 = vector.broadcast %12 : i32 to vector<1x256xi32>
    %14 = arith.remsi %10, %13 : vector<1x256xi32>
    %c0_i32_7 = arith.constant 0 : i32
    %15 = vector.broadcast %c0_i32_7 : i32 to vector<1x256xi32>
    %16 = arith.cmpi ne, %14, %15 : vector<1x256xi32>
    %c0_i32_8 = arith.constant 0 : i32
    %17 = vector.broadcast %c0_i32_8 : i32 to vector<1x256xi32>
    %18 = arith.cmpi slt, %14, %17 : vector<1x256xi32>
    %c0_i32_9 = arith.constant 0 : i32
    %19 = arith.cmpi slt, %12, %c0_i32_9 : i32
    %20 = vector.broadcast %19 : i1 to vector<1x256xi1>
    %21 = vector.broadcast %20 : vector<1x256xi1> to vector<1x256xi1>
    %22 = arith.xori %18, %21 : vector<1x256xi1>
    %23 = arith.andi %22, %16 : vector<1x256xi1>
    %24 = vector.broadcast %12 : i32 to vector<1x256xi32>
    %25 = arith.addi %14, %24 : vector<1x256xi32>
    %26 = arith.select %23, %25, %14 : vector<1x256xi1>, vector<1x256xi32>
    %cst_10 = arith.constant 0.000000e+00 : bf16
    %27 = vector.broadcast %cst_10 : bf16 to vector<16x256xbf16>
    %c0_i32_11 = arith.constant 0 : i32
    %28 = vector.broadcast %c0_i32_11 : i32 to vector<1x256xi32>
    %29 = arith.cmpi ne, %26, %28 : vector<1x256xi32>
    %30 = vector.shape_cast %29 : vector<1x256xi1> to vector<1x256xi1>
    %31 = vector.broadcast %30 : vector<1x256xi1> to vector<16x256xi1>
    %32 = arith.select %31, %9, %27 : vector<16x256xi1>, vector<16x256xbf16>
    %c15_i32 = arith.constant 15 : i32
    %33 = vector.broadcast %c15_i32 : i32 to vector<1x256xi32>
    %34 = arith.cmpi ne, %26, %33 : vector<1x256xi32>
    %35 = vector.shape_cast %34 : vector<1x256xi1> to vector<1x256xi1>
    %36 = vector.broadcast %35 : vector<1x256xi1> to vector<16x256xi1>
    %37 = arith.select %36, %9, %27 : vector<16x256xi1>, vector<16x256xbf16>
    %cst_12 = arith.constant 0.000000e+00 : bf16
    %38 = vector.broadcast %cst_12 : bf16 to vector<16x17xbf16>
    %39 = vector.extract_strided_slice %37 {offsets = [0, 0], sizes = [16, 239], strides = [1, 1]} : vector<16x256xbf16> to vector<16x239xbf16>
    %40 = tpu.concatenate %38, %39 in 1 : vector<16x17xbf16>, vector<16x239xbf16> -> vector<16x256xbf16>
    %cst_13 = arith.constant 0.000000e+00 : bf16
    %41 = vector.broadcast %cst_13 : bf16 to vector<16x16xbf16>
    %42 = vector.extract_strided_slice %9 {offsets = [0, 0], sizes = [16, 240], strides = [1, 1]} : vector<16x256xbf16> to vector<16x240xbf16>
    %43 = tpu.concatenate %41, %42 in 1 : vector<16x16xbf16>, vector<16x240xbf16> -> vector<16x256xbf16>
    %cst_14 = arith.constant 0.000000e+00 : bf16
    %44 = vector.broadcast %cst_14 : bf16 to vector<16x15xbf16>
    %45 = vector.extract_strided_slice %32 {offsets = [0, 0], sizes = [16, 241], strides = [1, 1]} : vector<16x256xbf16> to vector<16x241xbf16>
    %46 = tpu.concatenate %44, %45 in 1 : vector<16x15xbf16>, vector<16x241xbf16> -> vector<16x256xbf16>
    %cst_15 = arith.constant 0.000000e+00 : bf16
    %47 = vector.broadcast %cst_15 : bf16 to vector<16x1xbf16>
    %48 = vector.extract_strided_slice %37 {offsets = [0, 0], sizes = [16, 255], strides = [1, 1]} : vector<16x256xbf16> to vector<16x255xbf16>
    %49 = tpu.concatenate %47, %48 in 1 : vector<16x1xbf16>, vector<16x255xbf16> -> vector<16x256xbf16>
    %50 = vector.extract_strided_slice %32 {offsets = [0, 1], sizes = [16, 255], strides = [1, 1]} : vector<16x256xbf16> to vector<16x255xbf16>
    %cst_16 = arith.constant 0.000000e+00 : bf16
    %51 = vector.broadcast %cst_16 : bf16 to vector<16x1xbf16>
    %52 = tpu.concatenate %50, %51 in 1 : vector<16x255xbf16>, vector<16x1xbf16> -> vector<16x256xbf16>
    %53 = vector.extract_strided_slice %37 {offsets = [0, 15], sizes = [16, 241], strides = [1, 1]} : vector<16x256xbf16> to vector<16x241xbf16>
    %cst_17 = arith.constant 0.000000e+00 : bf16
    %54 = vector.broadcast %cst_17 : bf16 to vector<16x15xbf16>
    %55 = tpu.concatenate %53, %54 in 1 : vector<16x241xbf16>, vector<16x15xbf16> -> vector<16x256xbf16>
    %56 = vector.extract_strided_slice %9 {offsets = [0, 16], sizes = [16, 240], strides = [1, 1]} : vector<16x256xbf16> to vector<16x240xbf16>
    %cst_18 = arith.constant 0.000000e+00 : bf16
    %57 = vector.broadcast %cst_18 : bf16 to vector<16x16xbf16>
    %58 = tpu.concatenate %56, %57 in 1 : vector<16x240xbf16>, vector<16x16xbf16> -> vector<16x256xbf16>
    %59 = vector.extract_strided_slice %32 {offsets = [0, 17], sizes = [16, 239], strides = [1, 1]} : vector<16x256xbf16> to vector<16x239xbf16>
    %cst_19 = arith.constant 0.000000e+00 : bf16
    %60 = vector.broadcast %cst_19 : bf16 to vector<16x17xbf16>
    %61 = tpu.concatenate %59, %60 in 1 : vector<16x239xbf16>, vector<16x17xbf16> -> vector<16x256xbf16>
    %62 = tpu.concatenate %40, %43, %46, %49, %9, %52, %55, %58, %61 in 0 : vector<16x256xbf16>, vector<16x256xbf16>, vector<16x256xbf16>, vector<16x256xbf16>, vector<16x256xbf16>, vector<16x256xbf16>, vector<16x256xbf16>, vector<16x256xbf16>, vector<16x256xbf16> -> vector<144x256xbf16>
    %c0_20 = arith.constant 0 : index
    %c0_21 = arith.constant 0 : index
    %63 = vector.load %arg4[%c0_20, %c0_21] : memref<8x144xbf16, #tpu.memory_space<vmem>>, vector<8x144xbf16>
    %cst_22 = arith.constant dense<0.000000e+00> : vector<8x256xf32>
    %64 = tpu.matmul %63, %62, %cst_22 {dimension_numbers = #tpu.dot_dimension_numbers<[1], [0], [0], [1], [0, 0, 1, 1], [], []>} : vector<8x144xbf16>, vector<144x256xbf16>, vector<8x256xf32> -> vector<8x256xf32>
    %c0_23 = arith.constant 0 : index
    %c0_24 = arith.constant 0 : index
    %65 = vector.load %arg5[%c0_23, %c0_24] : memref<8x1xf32, #tpu.memory_space<vmem>>, vector<8x1xf32>
    %66 = vector.broadcast %65 : vector<8x1xf32> to vector<8x256xf32>
    %67 = arith.addf %64, %66 : vector<8x256xf32>
    %cst_25 = arith.constant 0.000000e+00 : f32
    %68 = vector.broadcast %cst_25 : f32 to vector<8x256xf32>
    %69 = arith.maximumf %67, %68 : vector<8x256xf32>
    %c0_26 = arith.constant 0 : index
    %c0_27 = arith.constant 0 : index
    %c0_28 = arith.constant 0 : index
    %70 = vector.load %arg6[%c0_26, %c0_27, %c0_28] : memref<1x8x256xf32, #tpu.memory_space<vmem>>, vector<1x8x256xf32>
    %71 = vector.shape_cast %70 : vector<1x8x256xf32> to vector<8x256xf32>
    %72 = vector.shape_cast %69 : vector<8x256xf32> to vector<1x8x256xf32>
    tpu.vector_store %arg6[%c0_26, %c0_27, %c0_28], %72 {strides = array<i32>} : memref<1x8x256xf32, #tpu.memory_space<vmem>>, vector<1x8x256xf32>,
    return
  }
  func.func @transform_0(%arg0: i32) -> (i32, i32, i32) {
    %c0_i32 = arith.constant 0 : i32
    %c0_i32_0 = arith.constant 0 : i32
    %c0_i32_1 = arith.constant 0 : i32
    return %arg0, %c0_i32, %c0_i32_0 : i32, i32, i32
  }
  func.func @transform_1(%arg0: i32) -> (i32, i32) {
    %c0_i32 = arith.constant 0 : i32
    %c0_i32_0 = arith.constant 0 : i32
    %c0_i32_1 = arith.constant 0 : i32
    return %c0_i32, %c0_i32_0 : i32, i32
  }
  func.func @transform_2(%arg0: i32) -> (i32, i32) {
    %c0_i32 = arith.constant 0 : i32
    %c0_i32_0 = arith.constant 0 : i32
    %c0_i32_1 = arith.constant 0 : i32
    return %c0_i32, %c0_i32_0 : i32, i32
  }
  func.func @transform_3(%arg0: i32) -> (i32, i32) {
    %c0_i32 = arith.constant 0 : i32
    %c0_i32_0 = arith.constant 0 : i32
    %c0_i32_1 = arith.constant 0 : i32
    return %c0_i32, %c0_i32_0 : i32, i32
  }
  func.func @transform_4(%arg0: i32) -> (i32, i32) {
    %c0_i32 = arith.constant 0 : i32
    %c0_i32_0 = arith.constant 0 : i32
    %c0_i32_1 = arith.constant 0 : i32
    return %c0_i32, %c0_i32_0 : i32, i32
  }
  func.func @transform_5(%arg0: i32) -> (i32, i32, i32) {
    %c0_i32 = arith.constant 0 : i32
    %c0_i32_0 = arith.constant 0 : i32
    %c0_i32_1 = arith.constant 0 : i32
    return %arg0, %c0_i32, %c0_i32_0 : i32, i32, i32
  }
}

</mosaic_0001>

<bundles_post_ra>
// kernel: tpu_custom_call.1
= control target key start
LH: loop header
LB: loop body
LE: loop exit
PB: predicated region body
PF: predicated region fallthrough
CT: control target
= control target key end

     0   :  { %10 = vsyncpa [#allocation3], 0  ;;  %s1444_s0 = inlined_call_operand.hbm [shape: bf16[2,8,256], index: 0, kind: input, shape index: {}]   ;;  %s1445_s1 = inlined_call_operand.hbm [shape: bf16[16,8], index: 1, kind: input, shape index: {}]   ;;  %s1446_s2 = inlined_call_operand.hbm [shape: f32[16,1], index: 2, kind: input, shape index: {}]   ;;  %s1447_s3 = inlined_call_operand.hbm [shape: bf16[8,144], index: 3, kind: input, shape index: {}]   ;;  %s1448_s4 = inlined_call_operand.hbm [shape: f32[8,1], index: 4, kind: input, shape index: {}]   ;;  %s1449_s5 = inlined_call_operand.hbm [shape: f32[2,8,256], index: 5, kind: output, shape index: {}]  }
   0x1   :  { %12 = vsyncpa [#allocation3 + $0x1], 0 }
   0x2   :  { %13 = vsyncpa [#allocation6], 0 }
   0x3   :  { %14 = vsyncpa [#allocation9], 0 }
   0x4   :  { %15 = vsyncpa [#allocation4], 0 }
   0x5   :  { %17 = vsyncpa [#allocation4 + $0x1], 0  ;;  %s1146_s18 = smov 0   ;;  %s1148_s19 = smov 0  }
   0x6   :  { %s1150_s20 = smov 0   ;;  %s1152_s21 = smov 0  }
   0x7 LB: > { %s1097_s22 = smov [#allocation5]   ;;  %s1167_s24 = sadd.s32 4294967295, %s1095_s21   ;;  %s1095_s21 = sphi %s1152_s21, %s1473_s21   ;;  %s1091_s20 = sphi %s1150_s20, %s1472_s20   ;;  %s1087_s19 = sphi %s1148_s19, %s1471_s19   ;;  %s1083_s18 = sphi %s1146_s18, %s1470_s18  }
   0x8   : > { %s176_s23 = sshll.u32 %s1097_s22, 4  ;;  %p730_p0 = scmp.ge.s32.totalorder %s1095_s21, 1  ;;  %s1172_s23 = int_to_ptr.vmem [resolvable:$true] %s176_s23 }
   0x9   : > { %p1450_p1 = scmp.eq.s32.totalorder %s1167_s24, 0  ;;  %p164_p2 = scmp.lt.s32.totalorder %s1095_s21, 3 }
   0xa   : > { %s1098_s26 = smov [#allocation8]   ;;  %s1099_s29 = smov [#allocation7]  }
   0xb   : > { %p1174_p3 = pnand %p730_p0, %p164_p2  ;;  %s203_s27 = sshll.u32 %s1098_s26, 4  ;;  %s1187_s27 = int_to_ptr.vmem [resolvable:$true] %s203_s27 }
   0xc   : > { %s189_s30 = sshll.u32 %s1099_s29, 4  ;;  %s879_s8 = scalar_lea.hbm %s1445_s1, 128  ;;  %s1189_s30 = int_to_ptr.vmem [resolvable:$true] %s189_s30 }
   0xd   : > { %s1453_s25 = scalar_select %p1174_p3, 1, 0 }
   0xe   : > { %p793_p5 = pneg %p1174_p3  ;;  %p880_p7 = scmp.ne.s32.totalorder %s1445_s1, %s879_s8 }
   0xf   : > { %p886_p11 = scmp.lt.u32.totalorder %s879_s8, %s1445_s1 }
  0x10   : > { %p1183_p6 = pnand %p793_p5, %p1450_p1 }
  0x12   : > { %p1199_p8 = pneg %p1183_p6 }
  0x14   : > { %p882_p9 = pnand %p1199_p8, %p880_p7 }
  0x16   : > { %p883_p10 = pneg %p882_p9 }
  0x18   : > { %p888_p12 = pnand %p886_p11, %p883_p10 }
  0x1a   : > { %891 = shalt.err (!%p888_p12)
}
  0x1b   : > { %s892_s14 = scalar_lea.vmem %s1172_s23, 128  ;;  %p900_p5 = scmp.lt.s32.totalorder %s1172_s23, %s1172_s23 }
  0x1c   : > { %p893_p13 = scmp.ne.s32.totalorder %s1172_s23, %s892_s14  ;;  %p901_p4 = scmp.lt.s32.totalorder %s892_s14, %s892_s14 }
  0x1e   : > { %p895_p0 = pnand %p893_p13, %p1199_p8  ;;  %p902_p7 = por %p901_p4, %p900_p5 }
  0x20   : > { %p896_p2 = pneg %p895_p0 }
  0x22   : > { %p903_p9 = pnand %p902_p7, %p896_p2 }
  0x24   : > { %906 = shalt.err (!%p903_p9)
}
  0x25   : > { %s1100_s15 = smov 64   ;;  %s1101_s16 = smov 4  }
  0x26   : > { %796 = dma.hbm_to_vmem [thread:$0]  (!%p1183_p6), %s1445_s1, 128, %s1172_s23, [#allocation6], %s1100_s15, %s1100_s15, %s1101_s16  }
  0x27   : > { %s907_s6 = scalar_lea.hbm %s1447_s3, 128 }
  0x28   : > { %p908_p4 = scmp.ne.s32.totalorder %s1447_s3, %s907_s6  ;;  %p914_p12 = scmp.lt.u32.totalorder %s907_s6, %s1447_s3 }
  0x2a   : > { %p910_p10 = pnand %p908_p4, %p1199_p8 }
  0x2c   : > { %p911_p11 = pneg %p910_p10 }
  0x2e   : > { %p916_p13 = pnand %p914_p12, %p911_p11 }
  0x30   : > { %919 = shalt.err (!%p916_p13)
}
  0x31   : > { %s920_s23 = scalar_lea.vmem %s1187_s27, 128  ;;  %p928_p7 = scmp.lt.s32.totalorder %s1187_s27, %s1187_s27 }
  0x32   : > { %p921_p0 = scmp.ne.s32.totalorder %s1187_s27, %s920_s23  ;;  %p929_p9 = scmp.lt.s32.totalorder %s920_s23, %s920_s23 }
  0x34   : > { %p923_p2 = pnand %p921_p0, %p1199_p8  ;;  %p930_p4 = por %p929_p9, %p928_p7 }
  0x36   : > { %p924_p5 = pneg %p923_p2 }
  0x38   : > { %p931_p10 = pnand %p930_p4, %p924_p5 }
  0x3a   : > { %934 = shalt.err (!%p931_p10)
}
  0x3b   : > { %802 = dma.hbm_to_vmem [thread:$0]  (!%p1183_p6), %s1447_s3, 128, %s1187_s27, [#allocation9]  }
  0x3c   : > { %s935_s16 = scalar_lea.hbm %s1446_s2, 256 }
  0x3d   : > { %p936_p11 = scmp.ne.s32.totalorder %s1446_s2, %s935_s16  ;;  %p942_p0 = scmp.lt.u32.totalorder %s935_s16, %s1446_s2 }
  0x3f   : > { %p938_p12 = pnand %p936_p11, %p1199_p8 }
  0x41   : > { %p939_p13 = pneg %p938_p12 }
  0x43   : > { %p944_p2 = pnand %p942_p0, %p939_p13 }
  0x45   : > { %947 = shalt.err (!%p944_p2)
}
  0x46   : > { %s948_s27 = scalar_lea.vmem %s1189_s30, 256  ;;  %p956_p4 = scmp.lt.s32.totalorder %s1189_s30, %s1189_s30 }
  0x47   : > { %p949_p5 = scmp.ne.s32.totalorder %s1189_s30, %s948_s27  ;;  %p957_p10 = scmp.lt.s32.totalorder %s948_s27, %s948_s27 }
  0x49   : > { %p951_p7 = pnand %p949_p5, %p1199_p8  ;;  %p958_p11 = por %p957_p10, %p956_p4 }
  0x4b   : > { %p952_p9 = pneg %p951_p7 }
  0x4d   : > { %p959_p12 = pnand %p958_p11, %p952_p9 }
  0x4f   : > { %962 = shalt.err (!%p959_p12)
}
  0x50   : > { %s1102_s6 = smov 128   ;;  %s1103_s7 = smov 8  }
  0x51   : > { %799 = dma.hbm_to_vmem [thread:$0]  (!%p1183_p6), %s1446_s2, 256, %s1189_s30, [#allocation6], %s1102_s6, %s1102_s6, %s1103_s7  }
  0x52   : > { %s1104_s10 = smov [#allocation10]   ;;  %s963_s14 = scalar_lea.hbm %s1448_s4, 128 }
  0x53   : > { %s214_s23 = sshll.u32 %s1104_s10, 4  ;;  %p964_p13 = scmp.ne.s32.totalorder %s1448_s4, %s963_s14  ;;  %s215_s23 = int_to_ptr.vmem [resolvable:$true] %s214_s23 }
  0x54   : > { %p970_p5 = scmp.lt.u32.totalorder %s963_s14, %s1448_s4 }
  0x55   : > { %p966_p0 = pnand %p964_p13, %p1199_p8 }
  0x57   : > { %p967_p2 = pneg %p966_p0 }
  0x59   : > { %p972_p7 = pnand %p970_p5, %p967_p2 }
  0x5b   : > { %975 = shalt.err (!%p972_p7)
}
  0x5c   : > { %s976_s30 = scalar_lea.vmem %s215_s23, 128  ;;  %p984_p11 = scmp.lt.s32.totalorder %s215_s23, %s215_s23 }
  0x5d   : > { %p977_p9 = scmp.ne.s32.totalorder %s215_s23, %s976_s30  ;;  %p985_p12 = scmp.lt.s32.totalorder %s976_s30, %s976_s30 }
  0x5f   : > { %p979_p4 = pnand %p977_p9, %p1199_p8  ;;  %p986_p1 = por %p985_p12, %p984_p11 }
  0x61   : > { %p980_p10 = pneg %p979_p4 }
  0x63   : > { %p987_p3 = pnand %p986_p1, %p980_p10 }
  0x65   : > { %990 = shalt.err (!%p987_p3)
}
  0x66   : > { %805 = dma.hbm_to_vmem [thread:$0]  (!%p1183_p6), %s1448_s4, 128, %s215_s23, [#allocation9]  }
  0x67   : > { %s729_s11 = sadd.s32 4294967294, %s1095_s21   ;;  %s1286_s28 = sadd.s32 1, %s1095_s21  }
  0x68   : > { %s27_s27 = ssub.s32 %s1095_s21, %s1286_s28  ;;  %s30_s6 = sadd.s32 1, %s1091_s20 }
  0x69   : > { %p28_p1 = scmp.eq.s32.totalorder %s27_s27, 0  ;;  %p37_p3 = scmp.ne.s32.totalorder %s1091_s20, %s1087_s19 }
  0x6a   : > { %p38_p8 = scmp.eq.s32.totalorder %s1095_s21, 0  ;;  %p43_p13 = scmp.ne.s32.totalorder %s1087_s19, %s1083_s18 }
  0x6b   : > { %s1297_s7 = scalar_select %p28_p1, %s1091_s20, %s30_s6  }
  0x6c   : > { %p1299_p0 = por %p38_p8, %p37_p3  ;;  %p1457_p2 = scmp.eq.s32.totalorder %s1167_s24, 0 }
  0x6d   : > { %p151_p5 = scmp.eq.s32.totalorder %s1167_s24, 1  ;;  %p157_p7 = scmp.eq.s32.totalorder %s729_s11, 1 }
  0x6e   : > { %p1305_p6 = por %p1457_p2, %p43_p13  ;;  %p818_p9 = scmp.lt.s32.totalorder %s1095_s21, 2 }
  0x6f   : > { %s225_s10 = sand.u32 1, %s1091_s20   ;;  %p1312_p4 = por %p151_p5, %p37_p3 }
  0x70   : > { %p1316_p10 = por %p157_p7, %p43_p13  ;;  %s736_s13 = sshll.u32 %s225_s10, 3 }
  0x71   : > { %s1459_s23 = scalar_select %p1312_p4, 1, 0 }
  0x72   : > { %s1460_s12 = scalar_select %p1316_p10, 1, 0 }
  0x73   : > { %s771_s14 = sshll.u32 %s1095_s21, 7  ;;  %s229_s22 = scalar_lea.vmem [#allocation2], %s736_s13 }
  0x74   : > { %s1324_s17 = scalar_lea.hbm %s1444_s0, %s771_s14  ;;  %s237_s30 = sshll.u32 %s229_s22, 4  ;;  %s1326_s30 = int_to_ptr.vmem [resolvable:$true] %s237_s30 }
  0x75   : > { %p1330_p11 = pnand %p818_p9, %p1299_p0  ;;  %s226_s29 = scalar_lea.sflag [#allocation3], %s225_s10 }
  0x76   : > { %s991_s11 = scalar_lea.hbm %s1324_s17, 128  ;;  %s996_s13 = scalar_lea.hbm %s1444_s0, 256 }
  0x77   : > { %p992_p12 = scmp.ne.s32.totalorder %s1324_s17, %s991_s11  ;;  %p993_p1 = pneg %p1330_p11 }
  0x78   : > { %p997_p13 = scmp.lt.u32.totalorder %s1324_s17, %s1444_s0  ;;  %p998_p0 = scmp.lt.u32.totalorder %s996_s13, %s991_s11 }
  0x79   : > { %p994_p3 = pnand %p993_p1, %p992_p12  ;;  %p1000_p5 = scmp.lt.u32.totalorder %s991_s11, %s1324_s17 }
  0x7a   : > { %p999_p2 = por %p998_p0, %p997_p13 }
  0x7b   : > { %p995_p8 = pneg %p994_p3 }
  0x7c   : > { %p1001_p7 = por %p1000_p5, %p999_p2 }
  0x7e   : > { %p1002_p9 = pnand %p1001_p7, %p995_p8 }
  0x80   : > { %1005 = shalt.err (!%p1002_p9)
}
  0x81   : > { %s1006_s10 = scalar_lea.vmem %s1326_s30, 128  ;;  %s1105_s15 = smov [#allocation2]  }
  0x82   : > { %p1007_p12 = scmp.ne.s32.totalorder %s1326_s30, %s1006_s10  ;;  %s1011_s16 = sshll.u32 %s1105_s15, 4  ;;  %s1012_s16 = int_to_ptr.vmem [resolvable:$false] %s1011_s16 }
  0x83   : > { %s1013_s22 = scalar_lea.vmem %s1012_s16, 256  ;;  %p1014_p4 = scmp.lt.s32.totalorder %s1326_s30, %s1012_s16 }
  0x84   : > { %p1009_p3 = pnand %p1007_p12, %p993_p1  ;;  %p1015_p13 = scmp.lt.s32.totalorder %s1013_s22, %s1006_s10 }
  0x86   : > { %p1010_p10 = pneg %p1009_p3  ;;  %p1016_p0 = por %p1015_p13, %p1014_p4 }
  0x88   : > { %p1017_p2 = pnand %p1016_p0, %p1010_p10 }
  0x8a   : > { %1020 = shalt.err (!%p1017_p2)
}
  0x8b   : > { %809 = dma.hbm_to_vmem [thread:$0]  (!%p1330_p11), %s1324_s17, 128, %s1326_s30, %s226_s29  }
  0x8c   : > { %p1462_p8 = scmp.ne.s32.totalorder %s1453_s25, 0 }
  0x8d   : > { %s1362_s11 = sand.u32 (!%p1462_p8), 1, %s1087_s19  }
  0x8e   : > { %246 = sbr.rel (%p1462_p8) target bundleno = 771 (0x303), region = 40  ;;  %s740_s27 = sshll.u32 (!%p1462_p8), %s1362_s11, 3 }
  0x8f   : > { %s249_s6 = scalar_lea.sflag (!%p1462_p8), [#allocation3], %s1362_s11  ;;  %s252_s13 = scalar_lea.vmem (!%p1462_p8), [#allocation2], %s740_s27 }
  0x95   : > { %1066 = dma.done.wait (%p1305_p6), %s249_s6, 128  }
  0x96   : > { %1068 = vsyncadd (%p1305_p6), %s249_s6, 4294967168  ;;  %p1463_p4 = scmp.eq.s32.totalorder %s1167_s24, 0 }
  0x98   : > { %1070 = dma.done.wait (%p1463_p4), [#allocation6], 384   ;;  %p1464_p10 = pmov %p1463_p4 }
  0x99   : > { %p1465_p11 = pmov %p1463_p4 }
  0x9a   : > { %1072 = vsyncadd (%p1464_p10), [#allocation6], 4294966912 }
  0x9b   : > { %1074 = dma.done.wait (%p1465_p11), [#allocation9], 256   ;;  %p1466_p1 = pmov %p1463_p4 }
  0x9c   : > { %v1106_v0 = vmov 0   ;;  %v298_v1 = vld [vmem:[%s252_s13] sm:$0xff]  ;;  %vm327_vm0 = vcmask 1043456   ;;  %v301_v4 = vld [vmem:[#allocation7] sm:$0xff]  ;;  %v876_v6 = vld [vmem:[#allocation5] sm:$0xff]   ;;  %vm323_vm1 = vcmask 64512   ;;  %v383_v8 = vlaneseq }
  0x9d   : > { %1076 = vsyncadd (%p1466_p1), [#allocation9], 4294967040  ;;  %366 = vmatprep.mubr.bf16.mxu0 %v1106_v0  ;;  %873 = vset.pattern.permute.xlu0 %v1106_v0  ;;  %v748_v2 = vcombine.high %v298_v1, %v298_v1  ;;  %v747_v3 = vcombine.low %v298_v1, %v298_v1  ;;  %v302_v7 = vld [vmem:[#allocation7 + $0x8] sm:$0xff]  ;;  %s1107_s25 = smov 16   ;;  %s1108_s9 = smov 17   ;;  %v546_v42 = vld [vmem:[#allocation10] sm:$0xff] }
  0x9e   : > { %305 = vperm.xlu0 %873, %v301_v4   ;;  %v384_v9 = vand.u32 127, %v383_v8  ;;  %v419_v13 = vshrl.u32 %v383_v8, 7  ;;  %s1109_s17 = smov 15   ;;  %s1110_s30 = smov 1   ;;  %v545_v43 = vld [vmem:[#allocation8] sm:$0xff]  ;;  %vm470_vm12 = vcmask 130048  }
  0x9f   : > { %749 = vmatprep.subr.msk.bf16.mxu0 %vm327_vm0, %v748_v2  ;;  %v329_v5 = vsel %vm327_vm0, %v747_v3, 0  ;;  %s1111_s26 = smov 127   ;;  %s1112_s29 = smov 113   ;;  %v752_v44 = vcombine.high %v545_v43, %v545_v43  ;;  %vm456_vm13 = vcmask 138240   ;;  %vm755_vm15 = vmneg %vm470_vm12  ;;  %vm483_vm0 = vcmask 121856  }
  0xa0   : > { %335 = vmatpush1.bf16.msra.mxu0 %v329_v5  ;;  %v385_v10 = vadd.s32 128, %v384_v9  ;;  %v390_v11 = vand.u32 15, %v384_v9  ;;  %v420_v15 = vsub.s32 0, %v419_v13  ;;  %v424_v25 = vsub.s32 4, %v419_v13  ;;  %s1113_s8 = smov 112   ;;  %s1114_s14 = smov 111   ;;  %vm753_vm14 = vmneg %vm456_vm13 }
  0xa1   : > { %765 = vmatprep.mubr.msk.bf16.mxu1 %vm470_vm12, %v752_v44  ;;  %v751_v5 = vcombine.low %v545_v43, %v545_v43  ;;  %s745_s10 = sshll.u32 %s1362_s11, 4  ;;  %s772_s15 = sshll.u32 %s1167_s24, 8 }
  0xa2   : > { %310 = vperm.xlu0 %873, %v302_v7   ;;  %v397_v12 = vand.u32 15, %v385_v10  ;;  %vm430_vm2 = vcmp.ne.s32.totalorder %v390_v11, 15  ;;  %vm410_vm5 = vcmp.ne.s32.totalorder %v390_v11, 0  ;;  %s294_s16 = scalar_lea.vmem [#allocation11], %s745_s10  ;;  %s1400_s13 = scalar_lea.hbm %s1449_s5, %s772_s15 }
  0xa3   : > { %750 = vmatmul.mubr.msk.bf16.vlgmr.msra.gmra.mrb[0].mxu0 %vm323_vm1, %v876_v6  ;;  %vm757_vm1 = vmneg %vm483_vm0  ;;  %s621_s22 = sshll.u32 %s294_s16, 4  ;;  %s607_s24 = scalar_lea.sflag [#allocation4], %s1362_s11  ;;  %s1402_s22 = int_to_ptr.vmem [resolvable:$true] %s621_s22 }
  0xa4   : > { %vm431_vm3 = vcmp.ne.s32.totalorder %v397_v12, 15  ;;  %vm411_vm6 = vcmp.ne.s32.totalorder %v397_v12, 0  ;;  %p1467_p5 = scmp.ne.s32.totalorder %s1459_s23, 0 }
  0xa5   : > { %vm436_vm4 = vmpackc.low %vm431_vm3, %vm430_vm2  ;;  %vm494_vm2 = vcmask 7168  }
  0xa6   : > { %v437_v16 = vsel %vm436_vm4, 65537, %v1106_v0  ;;  %vm416_vm7 = vmpackc.low %vm411_vm6, %vm410_vm5  ;;  %vm505_vm4 = vcmask 1039360   ;;  %vm516_vm5 = vcmask 924672   ;;  %vm527_vm6 = vcmask 916480  }
  0xa7   : > { %v441_v23 = vrot.slane %v437_v16, %v420_v15  ;;  %v417_v24 = vsel %vm416_vm7, 65537, %v1106_v0  ;;  %v445_v34 = vrot.slane %v437_v16, %v424_v25  ;;  %vm759_vm3 = vmneg %vm494_vm2  ;;  %vm538_vm7 = vcmask 908288  }
  0xa8   : > { %v421_v31 = vrot.slane %v417_v24, %v420_v15  ;;  %v425_v40 = vrot.slane %v417_v24, %v424_v25 }
  0xa9   : > { %vm446_vm8 = vcmp.ne.s16.totalorder %v441_v23, 0  ;;  %vm447_vm10 = vcmp.ne.s16.totalorder %v445_v34, 0 }
  0xaa   : > { %vm426_vm9 = vcmp.ne.s16.totalorder %v421_v31, 0  ;;  %vm427_vm11 = vcmp.ne.s16.totalorder %v425_v40, 0 }
 0x11d   : > { %v306_v14 = vpop.permute.xlu0 %305 }
 0x121   : > { %v311_v20 = vpop.permute.xlu0 %310 }
 0x176   : > { %v368_v17 = vpop.f32.mrb[0].mxu0 }
 0x177   : > { %v369_v18 = vadd.f32 %v368_v17, %v306_v14  ;;  %v370_v19 = vpop.f32.mrb[1].mxu0 }
 0x178   : > { %v371_v21 = vadd.f32 %v370_v19, %v306_v14  ;;  %v372_v22 = vpop.f32.mrb[2].mxu0 }
 0x179   : > { %v373_v26 = vadd.f32 %v372_v22, %v311_v20  ;;  %v374_v27 = vpop.f32.mrb[3].mxu0  ;;  %v377_v29 = vmax.f32 %v369_v18, 0.0 }
 0x17a   : > { %v375_v28 = vadd.f32 %v374_v27, %v311_v20  ;;  %v378_v32 = vmax.f32 %v371_v21, 0.0 }
 0x17b   : > { %v379_v30 = vmax.f32 %v373_v26, 0.0 }
 0x17c   : > { %v380_v33 = vmax.f32 %v375_v28, 0.0 }
 0x17d   : > { %v1378_v35 = vpack.c.bf16 %v379_v30, %v377_v29 }
 0x17e   : > { %v1380_v36 = vpack.c.bf16 %v380_v33, %v378_v32 }
 0x17f   : > { %466 = vrot.lane.b32.xlu0 %v1378_v35, %s1107_s25  ;;  %v448_v37 = vsel %vm446_vm8, %v1378_v35, 0  ;;  %v428_v38 = vsel %vm426_vm9, %v1378_v35, 0 }
 0x180   : > { %452 = vrot.lane.b32.xlu1 %v448_v37, %s1108_s9  ;;  %v449_v39 = vsel %vm447_vm10, %v1380_v36, 0  ;;  %v429_v41 = vsel %vm427_vm11, %v1380_v36, 0 }
 0x183   : > { %479 = vrot.lane.b32.xlu0 %v428_v38, %s1109_s17 }
 0x184   : > { %454 = vrot.lane.b32.xlu1 %v449_v39, %s1108_s9  ;;  %s1115_s9 = smov [#allocation11]  }
 0x187   : > { %490 = vrot.lane.b32.xlu0 %v448_v37, %s1110_s30 }
 0x188   : > { %468 = vrot.lane.b32.xlu1 %v1380_v36, %s1107_s25  ;;  %s1021_s25 = scalar_lea.vmem %s1402_s22, 256 }
 0x189   : > { %p1022_p6 = scmp.ne.s32.totalorder %s1402_s22, %s1021_s25 }
 0x18b   : > { %501 = vrot.lane.b32.xlu0 %v428_v38, %s1111_s26  ;;  %p1023_p7 = pnand %p1022_p6, %p1467_p5 }
 0x18c   : > { %481 = vrot.lane.b32.xlu1 %v429_v41, %s1109_s17  ;;  %s1025_s17 = sshll.u32 %s1115_s9, 4  ;;  %s1026_s17 = int_to_ptr.vmem [resolvable:$false] %s1025_s17 }
 0x18d   : > { %p1024_p9 = pneg %p1023_p7  ;;  %p1028_p12 = scmp.lt.s32.totalorder %s1402_s22, %s1026_s17 }
 0x18f   : > { %512 = vrot.lane.b32.xlu0 %v448_v37, %s1112_s29 }
 0x190   : > { %492 = vrot.lane.b32.xlu1 %v449_v39, %s1110_s30  ;;  %s1027_s30 = scalar_lea.vmem %s1026_s17, 512 }
 0x191   : > { %p1029_p3 = scmp.lt.s32.totalorder %s1027_s30, %s1021_s25 }
 0x193   : > { %523 = vrot.lane.b32.xlu0 %v1378_v35, %s1113_s8  ;;  %p1030_p13 = por %p1029_p3, %p1028_p12 }
 0x194   : > { %503 = vrot.lane.b32.xlu1 %v429_v41, %s1111_s26 }
 0x195   : > { %p1031_p0 = pnand %p1030_p13, %p1024_p9 }
 0x197   : > { %534 = vrot.lane.b32.xlu0 %v428_v38, %s1114_s14 }
 0x198   : > { %514 = vrot.lane.b32.xlu1 %v449_v39, %s1112_s29 }
 0x19b   : > { %549 = vperm.xlu0 %873, %v546_v42  }
 0x19c   : > { %525 = vrot.lane.b32.xlu1 %v1380_v36, %s1113_s8 }
 0x1a0   : > { %536 = vrot.lane.b32.xlu1 %v429_v41, %s1114_s14 }
 0x1f1   : > { %v467_v46 = vpop.permute.xlu0 %466 }
 0x1f2   : > { %v453_v45 = vpop.permute.xlu1 %452 }
 0x1f5   : > { %v480_v49 = vpop.permute.xlu0 %479 }
 0x1f6   : > { %v455_v47 = vpop.permute.xlu1 %454 }
 0x1f7   : > { %v457_v48 = vsel %vm456_vm13, %v453_v45, %v455_v47 }
 0x1f8   : > { %561 = vmatprep.subr.bf16.mxu1 %v457_v48 }
 0x1f9   : > { %754 = vmatpush1.bf16.msk.msra.mxu1 %vm753_vm14, %v453_v45  ;;  %v491_v53 = vpop.permute.xlu0 %490 }
 0x1fa   : > { %v469_v50 = vpop.permute.xlu1 %468 }
 0x1fb   : > { %v471_v51 = vsel %vm470_vm12, %v467_v46, %v469_v50 }
 0x1fc   : > { %563 = vmatprep.subr.bf16.mxu1 %v471_v51 }
 0x1fd   : > { %756 = vmatpush1.bf16.msk.msra.mxu1 %vm755_vm15, %v467_v46  ;;  %v502_v57 = vpop.permute.xlu0 %501 }
 0x1fe   : > { %v482_v52 = vpop.permute.xlu1 %481 }
 0x1ff   : > { %v484_v54 = vsel %vm483_vm0, %v480_v49, %v482_v52 }
 0x200   : > { %565 = vmatprep.subr.bf16.mxu1 %v484_v54 }
 0x201   : > { %758 = vmatpush1.bf16.msk.msra.mxu1 %vm757_vm1, %v480_v49  ;;  %v513_v60 = vpop.permute.xlu0 %512 }
 0x202   : > { %v493_v55 = vpop.permute.xlu1 %492 }
 0x203   : > { %v495_v56 = vsel %vm494_vm2, %v491_v53, %v493_v55 }
 0x204   : > { %567 = vmatprep.subr.bf16.mxu1 %v495_v56 }
 0x205   : > { %760 = vmatpush1.bf16.msk.msra.mxu1 %vm759_vm3, %v491_v53  ;;  %v524_v0 = vpop.permute.xlu0 %523 }
 0x206   : > { %v504_v58 = vpop.permute.xlu1 %503  ;;  %569 = vmatprep.subr.bf16.mxu1 %v1380_v36 }
 0x207   : > { %v506_v61 = vsel %vm505_vm4, %v502_v57, %v504_v58 }
 0x209   : > { %570 = vmatpush1.bf16.msra.mxu1 %v1378_v35  ;;  %v535_v3 = vpop.permute.xlu0 %534 }
 0x20a   : > { %v515_v59 = vpop.permute.xlu1 %514  ;;  %761 = vmatprep.subr.msk.bf16.mxu1 %vm505_vm4, %v504_v58 }
 0x20b   : > { %v517_v63 = vsel %vm516_vm5, %v513_v60, %v515_v59 }
 0x20d   : > { %572 = vmatpush1.bf16.msra.mxu1 %v506_v61 }
 0x20e   : > { %762 = vmatprep.subr.msk.bf16.mxu1 %vm516_vm5, %v515_v59  ;;  %v526_v62 = vpop.permute.xlu1 %525 }
 0x20f   : > { %v528_v1 = vsel %vm527_vm6, %v524_v0, %v526_v62 }
 0x211   : > { %574 = vmatpush1.bf16.msra.mxu1 %v517_v63 }
 0x212   : > { %763 = vmatprep.subr.msk.bf16.mxu1 %vm527_vm6, %v526_v62  ;;  %v537_v2 = vpop.permute.xlu1 %536 }
 0x213   : > { %v539_v4 = vsel %vm538_vm7, %v535_v3, %v537_v2 }
 0x215   : > { %576 = vmatpush1.bf16.msra.mxu1 %v528_v1 }
 0x216   : > { %764 = vmatprep.subr.msk.bf16.mxu1 %vm538_vm7, %v537_v2 }
 0x219   : > { %578 = vmatpush1.bf16.msra.mxu1 %v539_v4 }
 0x21a   : > { %v550_v6 = vpop.permute.xlu0 %549 }
 0x21c   : > { %594 = vmatmul.mubr.bf16.vlgmr.msra.gmra.mrb[0].mxu1 %v751_v5 }
 0x2ef   : > { %v595_v7 = vpop.f32.mrb[0].mxu1 }
 0x2f0   : > { %v596_v8 = vadd.f32 %v595_v7, %v550_v6  ;;  %v597_v9 = vpop.f32.mrb[1].mxu1 }
 0x2f1   : > { %v598_v10 = vadd.f32 %v597_v9, %v550_v6  ;;  %v599_v11 = vpop.f32.mrb[2].mxu1 }
 0x2f2   : > { %v602_v12 = vmax.f32 %v596_v8, 0.0  ;;  %v600_v13 = vpop.f32.mrb[3].mxu1 }
 0x2f3   : > { %v603_v14 = vmax.f32 %v598_v10, 0.0 }
 0x2f4   : > { %604 = vst [vmem:[%s294_s16] sm:$0xff] %v602_v12 }
 0x2f5   : > { %605 = vst [vmem:[%s294_s16 + $0x8] sm:$0xff] %v603_v14 }
 0x2f6   : > { %1034 = shalt.err (!%p1031_p0)
}
 0x2f7   : > { %s1035_s11 = scalar_lea.hbm %s1400_s13, 256  ;;  %s1039_s8 = scalar_lea.hbm %s1449_s5, 512 }
 0x2f8   : > { %p1036_p2 = scmp.ne.s32.totalorder %s1400_s13, %s1035_s11  ;;  %p1040_p10 = scmp.lt.u32.totalorder %s1400_s13, %s1449_s5 }
 0x2f9   : > { %p1041_p11 = scmp.lt.u32.totalorder %s1039_s8, %s1035_s11  ;;  %p1043_p6 = scmp.lt.u32.totalorder %s1035_s11, %s1400_s13 }
 0x2fa   : > { %p1037_p8 = pnand %p1036_p2, %p1467_p5 }
 0x2fb   : > { %p1042_p1 = por %p1041_p11, %p1040_p10 }
 0x2fc   : > { %p1038_p4 = pneg %p1037_p8 }
 0x2fd   : > { %p1044_p7 = por %p1043_p6, %p1042_p1 }
 0x2ff   : > { %p1045_p9 = pnand %p1044_p7, %p1038_p4 }
 0x301   : > { %1048 = shalt.err (!%p1045_p9)
}
 0x302   : > { %791 = dma.vmem_to_hbm [thread:$0]  (%p1467_p5), %s1402_s22, 256, %s1400_s13, %s607_s24  }
 0x303 PF: > { %s633_s15 = sand.u32 1, %s1083_s18   ;;  %p1468_p12 = scmp.ne.s32.totalorder %s1460_s12, 0 }
 0x304   : > { %p1469_p3 = scmp.ge.s32.totalorder %s1095_s21, 2  ;;  %s634_s16 = scalar_lea.sflag [#allocation4], %s633_s15 }
 0x306   : > { %p811_p13 = pnand %p1469_p3, %p1468_p12 }
 0x308   : > { %1078 = dma.done.wait (!%p811_p13), %s634_s16, 256  }
 0x309   : > { %1080 = vsyncadd (!%p811_p13), %s634_s16, 4294967040  ;;  %p20_p0 = scmp.ge.s32.totalorder %s1286_s28, 4   ;;  %s1470_s18 = smov %s1087_s19 }
 0x30a   : > { %s1471_s19 = smov %s1091_s20  ;;  %s1472_s20 = smov %s1297_s7 }
 0x30b   : > { %s1473_s21 = smov %s1286_s28  ;;  %22 = sbr.rel (!%p20_p0) target bundleno = 7 (0x7), region = 101 }
 0x312   :  { %639 = vsyncpa [#allocation3], 1 }
 0x313   :  { %641 = vsyncpa [#allocation3 + $0x1], 1 }
 0x314   :  { %642 = vsyncpa [#allocation6], 1 }
 0x315   :  { %643 = vsyncpa [#allocation9], 1 }
 0x316   :  { %644 = vsyncpa [#allocation4], 1 }
 0x317   :  { %646 = vsyncpa [#allocation4 + $0x1], 1 }

</bundles_post_ra>
